<compile_context>
chip_gen: v7x
topology: tpu7x:2x2x1
jax: 0.10.0
libtpu: 0.0.40
codegen_flags: <defaults>
</compile_context>

<pallas_src>
import jax
import jax.numpy as jnp
import numpy as np
from jax import lax
from jax.experimental import pallas as pl
from jax.experimental.pallas import tpu as pltpu


# ----------------------------------------------------------------------------
# Pallas kernel: full LSTM recurrence + output projection in one invocation.
# ----------------------------------------------------------------------------
def _detector_kernel(
    seq_ref,     # (T*Bp, Fp)  bf16, time-major sequence (batch/feature padded)
    h0_ref,      # (Bp, H)     f32 initial hidden state
    c0_ref,      # (Bp, H)     f32 initial cell state
    wx_ref,      # (Fp, 4H)    bf16 fused input weights, gate order (i,f,o,g),
                 #             g-columns pre-scaled by 2
    wh_ref,      # (H, 4H)     bf16 fused recurrent weights, same layout
    b_ref,       # (1, 4H)     f32 combined bias, same layout / scaling
    woutT_ref,   # (H, Fp)     bf16 hidden2pred weight, transposed, F-padded
    bout_ref,    # (1, Fp)     f32 hidden2pred bias, F-padded
    pred_ref,    # out: (T*Bp, Fp) f32
    hn_ref,      # out: (Bp, H)    f32
    cn_ref,      # out: (Bp, H)    f32
    xw_sc,       # scratch VMEM (T*Bp, 4H) f32  precomputed x @ Wx + b
    hs_sc,       # scratch VMEM (T*Bp, H)  f32  all hidden states
):
    Bp, H = h0_ref.shape
    TB = hs_sc.shape[0]
    T = TB // Bp

    # Input->gate contributions for the whole sequence: one bf16 matmul with
    # f32 accumulation, off the recurrent critical path, bias folded in.
    xw_sc[...] = (
        jnp.dot(seq_ref[...], wx_ref[...], preferred_element_type=jnp.float32)
        + b_ref[...]
    )

    def step(t, carry):
        h, c = carry
        row = pl.multiple_of(t * Bp, Bp)   # sublane-aligned offset
        # One lane-dense (Bp, 4H) recurrent matmul per step (bf16 operands).
        gates = xw_sc[pl.ds(row, Bp), :] + jnp.dot(
            h.astype(jnp.bfloat16), wh_ref[...],
            preferred_element_type=jnp.float32,
        )
        # One sigmoid over the full contiguous (Bp, 4H) slab; the g-gate
        # pre-activation was pre-scaled by 2, so tanh(z) == 2*sigmoid(2z) - 1.
        sig = jax.nn.sigmoid(gates)
        i_g = sig[:, :H]
        f_g = sig[:, H:2 * H]
        o_g = sig[:, 2 * H:3 * H]
        g_g = 2.0 * sig[:, 3 * H:] - 1.0

        c_new = f_g * c + i_g * g_g
        h_new = o_g * jnp.tanh(c_new)

        hs_sc[pl.ds(row, Bp), :] = h_new
        return (h_new, c_new)

    h_fin, c_fin = lax.fori_loop(
        0, T, step, (h0_ref[...], c0_ref[...]),
        unroll=True if T <= 8 else 8,   # full unroll only for short sequences
    )

    # Final states: written exactly once.
    hn_ref[...] = h_fin
    cn_ref[...] = c_fin

    # Batched hidden2pred: one (T*Bp, H) @ (H, Fp) matmul, single lane-dense
    # store (bulk bf16 cast of hs is off the recurrent chain).
    pred_ref[...] = (
        jnp.dot(hs_sc[...].astype(jnp.bfloat16), woutT_ref[...],
                preferred_element_type=jnp.float32)
        + bout_ref[...]
    )


# ----------------------------------------------------------------------------
# One-time parameter preparation (hoisted OUT of the per-call jitted path).
# ----------------------------------------------------------------------------
def prepare_params(params, pad_features=128):
    """Re-layout PyTorch-style LSTM/Linear weights into the kernel layout.

    Returns a dict of device arrays to be passed to detector_forward; run once.
    """
    w_ih, w_hh, b_ih, b_hh, w_out, b_out = (
        params["w_ih"], params["w_hh"], params["b_ih"], params["b_hh"],
        params["w_out"], params["b_out"],
    )
    H4, F = w_ih.shape
    H = H4 // 4
    Fp = max(pad_features, ((F + 127) // 128) * 128)

    # PyTorch gate order is (i, f, g, o); reorder to (i, f, o, g) so the kernel
    # applies a single sigmoid over the contiguous slab.  Pre-scale the g-gate
    # rows by 2 so tanh(z) can be computed as 2*sigmoid(2z) - 1.
    perm = jnp.array([0, 1, 3, 2], dtype=jnp.int32)
    gscale_w = jnp.array([1.0, 1.0, 1.0, 2.0], jnp.float32).reshape(4, 1, 1)
    gscale_b = jnp.array([1.0, 1.0, 1.0, 2.0], jnp.float32).reshape(4, 1)

    wih4 = w_ih.reshape(4, H, F)[perm] * gscale_w          # (4, H, F)
    whh4 = w_hh.reshape(4, H, H)[perm] * gscale_w          # (4, H, H)
    b4 = (b_ih + b_hh).reshape(4, H)[perm] * gscale_b      # (4, H)

    wx = wih4.reshape(4 * H, F).T                           # (F, 4H)
    wh = whh4.reshape(4 * H, H).T                           # (H, 4H)
    b2 = b4.reshape(1, 4 * H)                               # (1, 4H)
    woutT = w_out.T                                         # (H, F)
    bout2 = b_out.reshape(1, F)                             # (1, F)

    # Feature padding to a lane-dense 128 multiple + bf16 cast (MXU-native).
    wx_p = jnp.zeros((Fp, 4 * H), jnp.float32).at[:F, :].set(wx)
    woutT_p = jnp.zeros((H, Fp), jnp.float32).at[:, :F].set(woutT)
    bout_p = jnp.zeros((1, Fp), jnp.float32).at[:, :F].set(bout2)

    return {
        "wx": wx_p.astype(jnp.bfloat16),       # (Fp, 4H) bf16
        "wh": wh.astype(jnp.bfloat16),         # (H, 4H)  bf16
        "b": b2,                               # (1, 4H)  f32
        "woutT": woutT_p.astype(jnp.bfloat16), # (H, Fp)  bf16
        "bout": bout_p,                        # (1, Fp)  f32
    }


# ----------------------------------------------------------------------------
# Jitted forward: batch/feature padding + pallas_call + un-padding.
# ----------------------------------------------------------------------------
@jax.jit
def detector_forward(seq, state, kp):
    """Equivalent of Detector.forward(seq, state) -> (pred, (h_n, c_n)).

    seq:   (T, B, F) float32 (time-major, like nn.LSTM default)
    state: tuple (h0, c0), each (1, B, H) float32
    kp:    output of prepare_params(params)
    """
    T, B, F = seq.shape
    H = kp["wh"].shape[0]
    Fp = kp["wx"].shape[0]
    Bp = max(8, ((B + 7) // 8) * 8)       # sublane-pad batch to a multiple of 8

    h0 = state[0][0]  # (B, H)
    c0 = state[1][0]  # (B, H)

    # Zero-pad batch and feature dims; pad rows propagate harmlessly through
    # the recurrence and are sliced off below.
    seq_p = jnp.zeros((T, Bp, Fp), jnp.bfloat16).at[:, :B, :F].set(
        seq.astype(jnp.bfloat16))
    h0_p = jnp.zeros((Bp, H), jnp.float32).at[:B, :].set(h0)
    c0_p = jnp.zeros((Bp, H), jnp.float32).at[:B, :].set(c0)
    seq2 = seq_p.reshape(T * Bp, Fp)      # contiguous, free reshape

    vmem_spec = pl.BlockSpec(memory_space=pltpu.MemorySpace.VMEM)

    pred_flat, h_n, c_n = pl.pallas_call(
        _detector_kernel,
        out_shape=(
            jax.ShapeDtypeStruct((T * Bp, Fp), jnp.float32),  # pred (padded)
            jax.ShapeDtypeStruct((Bp, H), jnp.float32),       # h_n (padded)
            jax.ShapeDtypeStruct((Bp, H), jnp.float32),       # c_n (padded)
        ),
        in_specs=[vmem_spec] * 8,
        out_specs=(vmem_spec, vmem_spec, vmem_spec),
        scratch_shapes=[
            pltpu.VMEM((T * Bp, 4 * H), jnp.float32),   # precomputed x@Wx + b
            pltpu.VMEM((T * Bp, H), jnp.float32),       # all hidden states
        ],
    )(seq2, h0_p, c0_p, kp["wx"], kp["wh"], kp["b"], kp["woutT"], kp["bout"])

    pred = pred_flat.reshape(T, Bp, Fp)[:, :B, :F]
    # PyTorch returns state shaped (num_layers, B, H)
    return pred, (h_n[None, :B, :], c_n[None, :B, :])


# ----------------------------------------------------------------------------
# Pure-JAX reference (mirrors torch.nn.LSTM + nn.Linear semantics, all f32).
# ----------------------------------------------------------------------------
def detector_forward_ref(seq, state, params):
    w_ih, w_hh, b_ih, b_hh, w_out, b_out = (
        params["w_ih"], params["w_hh"], params["b_ih"], params["b_hh"],
        params["w_out"], params["b_out"],
    )
    hp = jax.lax.Precision.HIGHEST
    h0 = state[0][0]
    c0 = state[1][0]

    def step(carry, x_t):
        h, c = carry
        gates = (
            jnp.dot(x_t, w_ih.T, precision=hp)
            + jnp.dot(h, w_hh.T, precision=hp)
            + b_ih + b_hh
        )
        i_g, f_g, g_g, o_g = jnp.split(gates, 4, axis=-1)
        i_g = jax.nn.sigmoid(i_g)
        f_g = jax.nn.sigmoid(f_g)
        g_g = jnp.tanh(g_g)
        o_g = jax.nn.sigmoid(o_g)
        c = f_g * c + i_g * g_g
        h = o_g * jnp.tanh(c)
        return (h, c), h

    (h_n, c_n), hs = jax.lax.scan(step, (h0, c0), seq)
    pred = jnp.dot(hs, w_out.T, precision=hp) + b_out
    return pred, (h_n[None], c_n[None])


# ----------------------------------------------------------------------------
# Deterministic parameter init (PyTorch-style uniform(-1/sqrt(H), 1/sqrt(H))).
# ----------------------------------------------------------------------------
def init_params(key, input_size, hidden_size):
    k = 1.0 / np.sqrt(hidden_size)
    keys = jax.random.split(key, 6)
    u = lambda kk, shape: jax.random.uniform(kk, shape, jnp.float32, -k, k)
    return {
        "w_ih": u(keys[0], (4 * hidden_size, input_size)),
        "w_hh": u(keys[1], (4 * hidden_size, hidden_size)),
        "b_ih": u(keys[2], (4 * hidden_size,)),
        "b_hh": u(keys[3], (4 * hidden_size,)),
        "w_out": u(keys[4], (input_size, hidden_size)),
        "b_out": u(keys[5], (input_size,)),
    }


if __name__ == "__main__":
    INPUT_SIZE = 52   # Detector default Nfeatures
    HIDDEN = 64       # Detector default hidden_size
    T, B = 8, 2       # small seq length / batch

    root = jax.random.PRNGKey(0)
    k_param, k_seq = jax.random.split(root)

    params = init_params(k_param, INPUT_SIZE, HIDDEN)
    kp = prepare_params(params)   # one-time weight re-layout (hoisted)

    seq = jax.random.normal(k_seq, (T, B, INPUT_SIZE), jnp.float32)
    state = (
        jnp.zeros((1, B, HIDDEN), jnp.float32),
        jnp.zeros((1, B, HIDDEN), jnp.float32),
    )

    pred, (h_n, c_n) = detector_forward(seq, state, kp)
    jax.block_until_ready((pred, h_n, c_n))

    # Sanity-check against the all-f32 pure-JAX reference.  The kernel uses
    # bf16 matmul operands (f32 accumulation), so tolerance is loosened
    # accordingly for the 8-step recurrence.
    pred_r, (h_r, c_r) = detector_forward_ref(seq, state, params)
    np.testing.assert_allclose(np.asarray(pred), np.asarray(pred_r),
                               rtol=5e-2, atol=5e-2)
    np.testing.assert_allclose(np.asarray(h_n), np.asarray(h_r),
                               rtol=5e-2, atol=5e-2)
    np.testing.assert_allclose(np.asarray(c_n), np.asarray(c_r),
                               rtol=5e-2, atol=5e-2)

    assert pred.shape == (T, B, INPUT_SIZE)
    assert h_n.shape == (1, B, HIDDEN) and c_n.shape == (1, B, HIDDEN)

    print("KERNEL_OK")
</pallas_src>

<mosaic_0001>
module attributes {stable_mosaic.version = 11 : i64} {
  func.func @_detector_kernel(%arg0: memref<64x128xbf16, #tpu.memory_space<vmem>>, %arg1: memref<8x64xf32, #tpu.memory_space<vmem>>, %arg2: memref<8x64xf32, #tpu.memory_space<vmem>>, %arg3: memref<128x256xbf16, #tpu.memory_space<vmem>>, %arg4: memref<64x256xbf16, #tpu.memory_space<vmem>>, %arg5: memref<1x256xf32, #tpu.memory_space<vmem>>, %arg6: memref<64x128xbf16, #tpu.memory_space<vmem>>, %arg7: memref<1x128xf32, #tpu.memory_space<vmem>>, %arg8: memref<64x128xf32, #tpu.memory_space<vmem>>, %arg9: memref<8x64xf32, #tpu.memory_space<vmem>>, %arg10: memref<8x64xf32, #tpu.memory_space<vmem>>, %arg11: memref<64x256xf32, #tpu.memory_space<vmem>>, %arg12: memref<64x64xf32, #tpu.memory_space<vmem>>) attributes {dimension_semantics = [], scalar_prefetch = 0 : i64, scratch_operands = 2 : i64, tpu.core_type = #tpu.core_type<tc>} {
    %c0 = arith.constant 0 : index
    %c0_0 = arith.constant 0 : index
    %0 = vector.load %arg0[%c0, %c0_0] : memref<64x128xbf16, #tpu.memory_space<vmem>>, vector<64x128xbf16>
    %c0_1 = arith.constant 0 : index
    %c0_2 = arith.constant 0 : index
    %1 = vector.load %arg3[%c0_1, %c0_2] : memref<128x256xbf16, #tpu.memory_space<vmem>>, vector<128x256xbf16>
    %cst = arith.constant dense<0.000000e+00> : vector<64x256xf32>
    %2 = tpu.matmul %0, %1, %cst {dimension_numbers = #tpu.dot_dimension_numbers<[1], [0], [0], [1], [0, 0, 1, 1], [], []>} : vector<64x128xbf16>, vector<128x256xbf16>, vector<64x256xf32> -> vector<64x256xf32>
    %c0_3 = arith.constant 0 : index
    %c0_4 = arith.constant 0 : index
    %3 = vector.load %arg5[%c0_3, %c0_4] : memref<1x256xf32, #tpu.memory_space<vmem>>, vector<1x256xf32>
    %4 = vector.broadcast %3 : vector<1x256xf32> to vector<64x256xf32>
    %5 = arith.addf %2, %4 : vector<64x256xf32>
    %c0_5 = arith.constant 0 : index
    %c0_6 = arith.constant 0 : index
    %6 = vector.load %arg11[%c0_5, %c0_6] : memref<64x256xf32, #tpu.memory_space<vmem>>, vector<64x256xf32>
    tpu.vector_store %arg11[%c0_5, %c0_6], %5 {strides = array<i32>} : memref<64x256xf32, #tpu.memory_space<vmem>>, vector<64x256xf32>,
    %c0_7 = arith.constant 0 : index
    %c0_8 = arith.constant 0 : index
    %7 = vector.load %arg1[%c0_7, %c0_8] : memref<8x64xf32, #tpu.memory_space<vmem>>, vector<8x64xf32>
    %c0_9 = arith.constant 0 : index
    %c0_10 = arith.constant 0 : index
    %8 = vector.load %arg2[%c0_9, %c0_10] : memref<8x64xf32, #tpu.memory_space<vmem>>, vector<8x64xf32>
    %c0_i32 = arith.constant 0 : i32
    %c8_i32 = arith.constant 8 : i32
    %9 = arith.muli %c0_i32, %c8_i32 : i32
    %10 = tpu.assume_multiple %9, 8 : i32
    %11 = arith.index_cast %10 : i32 to index
    %c0_11 = arith.constant 0 : index
    %12 = vector.load %arg11[%11, %c0_11] : memref<64x256xf32, #tpu.memory_space<vmem>>, vector<8x256xf32>
    %13 = arith.truncf %7 : vector<8x64xf32> to vector<8x64xbf16>
    %c0_12 = arith.constant 0 : index
    %c0_13 = arith.constant 0 : index
    %14 = vector.load %arg4[%c0_12, %c0_13] : memref<64x256xbf16, #tpu.memory_space<vmem>>, vector<64x256xbf16>
    %cst_14 = arith.constant dense<0.000000e+00> : vector<8x256xf32>
    %15 = tpu.matmul %13, %14, %cst_14 {dimension_numbers = #tpu.dot_dimension_numbers<[1], [0], [0], [1], [0, 0, 1, 1], [], []>} : vector<8x64xbf16>, vector<64x256xbf16>, vector<8x256xf32> -> vector<8x256xf32>
    %16 = arith.addf %12, %15 : vector<8x256xf32>
    %17 = arith.negf %16 : vector<8x256xf32>
    %18 = math.exp %17 : vector<8x256xf32>
    %cst_15 = arith.constant 1.000000e+00 : f32
    %19 = vector.broadcast %cst_15 : f32 to vector<8x256xf32>
    %20 = arith.addf %19, %18 : vector<8x256xf32>
    %21 = arith.divf %19, %20 : vector<8x256xf32>
    %22 = vector.extract_strided_slice %21 {offsets = [0, 0], sizes = [8, 64], strides = [1, 1]} : vector<8x256xf32> to vector<8x64xf32>
    %23 = vector.extract_strided_slice %21 {offsets = [0, 64], sizes = [8, 64], strides = [1, 1]} : vector<8x256xf32> to vector<8x64xf32>
    %24 = vector.extract_strided_slice %21 {offsets = [0, 128], sizes = [8, 64], strides = [1, 1]} : vector<8x256xf32> to vector<8x64xf32>
    %25 = vector.extract_strided_slice %21 {offsets = [0, 192], sizes = [8, 64], strides = [1, 1]} : vector<8x256xf32> to vector<8x64xf32>
    %cst_16 = arith.constant 2.000000e+00 : f32
    %26 = vector.broadcast %cst_16 : f32 to vector<8x64xf32>
    %27 = arith.mulf %26, %25 : vector<8x64xf32>
    %cst_17 = arith.constant 1.000000e+00 : f32
    %28 = vector.broadcast %cst_17 : f32 to vector<8x64xf32>
    %29 = arith.subf %27, %28 : vector<8x64xf32>
    %30 = arith.mulf %23, %8 : vector<8x64xf32>
    %31 = arith.mulf %22, %29 : vector<8x64xf32>
    %32 = arith.addf %30, %31 : vector<8x64xf32>
    %33 = math.tanh %32 : vector<8x64xf32>
    %34 = arith.mulf %24, %33 : vector<8x64xf32>
    %35 = arith.index_cast %10 : i32 to index
    %c0_18 = arith.constant 0 : index
    %36 = vector.load %arg12[%35, %c0_18] : memref<64x64xf32, #tpu.memory_space<vmem>>, vector<8x64xf32>
    tpu.vector_store %arg12[%35, %c0_18], %34 {strides = array<i32>} : memref<64x64xf32, #tpu.memory_space<vmem>>, vector<8x64xf32>,
    %c1_i32 = arith.constant 1 : i32
    %c8_i32_19 = arith.constant 8 : i32
    %37 = arith.muli %c1_i32, %c8_i32_19 : i32
    %38 = tpu.assume_multiple %37, 8 : i32
    %39 = arith.index_cast %38 : i32 to index
    %c0_20 = arith.constant 0 : index
    %40 = vector.load %arg11[%39, %c0_20] : memref<64x256xf32, #tpu.memory_space<vmem>>, vector<8x256xf32>
    %41 = arith.truncf %34 : vector<8x64xf32> to vector<8x64xbf16>
    %c0_21 = arith.constant 0 : index
    %c0_22 = arith.constant 0 : index
    %42 = vector.load %arg4[%c0_21, %c0_22] : memref<64x256xbf16, #tpu.memory_space<vmem>>, vector<64x256xbf16>
    %cst_23 = arith.constant dense<0.000000e+00> : vector<8x256xf32>
    %43 = tpu.matmul %41, %42, %cst_23 {dimension_numbers = #tpu.dot_dimension_numbers<[1], [0], [0], [1], [0, 0, 1, 1], [], []>} : vector<8x64xbf16>, vector<64x256xbf16>, vector<8x256xf32> -> vector<8x256xf32>
    %44 = arith.addf %40, %43 : vector<8x256xf32>
    %45 = arith.negf %44 : vector<8x256xf32>
    %46 = math.exp %45 : vector<8x256xf32>
    %cst_24 = arith.constant 1.000000e+00 : f32
    %47 = vector.broadcast %cst_24 : f32 to vector<8x256xf32>
    %48 = arith.addf %47, %46 : vector<8x256xf32>
    %49 = arith.divf %47, %48 : vector<8x256xf32>
    %50 = vector.extract_strided_slice %49 {offsets = [0, 0], sizes = [8, 64], strides = [1, 1]} : vector<8x256xf32> to vector<8x64xf32>
    %51 = vector.extract_strided_slice %49 {offsets = [0, 64], sizes = [8, 64], strides = [1, 1]} : vector<8x256xf32> to vector<8x64xf32>
    %52 = vector.extract_strided_slice %49 {offsets = [0, 128], sizes = [8, 64], strides = [1, 1]} : vector<8x256xf32> to vector<8x64xf32>
    %53 = vector.extract_strided_slice %49 {offsets = [0, 192], sizes = [8, 64], strides = [1, 1]} : vector<8x256xf32> to vector<8x64xf32>
    %cst_25 = arith.constant 2.000000e+00 : f32
    %54 = vector.broadcast %cst_25 : f32 to vector<8x64xf32>
    %55 = arith.mulf %54, %53 : vector<8x64xf32>
    %cst_26 = arith.constant 1.000000e+00 : f32
    %56 = vector.broadcast %cst_26 : f32 to vector<8x64xf32>
    %57 = arith.subf %55, %56 : vector<8x64xf32>
    %58 = arith.mulf %51, %32 : vector<8x64xf32>
    %59 = arith.mulf %50, %57 : vector<8x64xf32>
    %60 = arith.addf %58, %59 : vector<8x64xf32>
    %61 = math.tanh %60 : vector<8x64xf32>
    %62 = arith.mulf %52, %61 : vector<8x64xf32>
    %63 = arith.index_cast %38 : i32 to index
    %c0_27 = arith.constant 0 : index
    %64 = vector.load %arg12[%63, %c0_27] : memref<64x64xf32, #tpu.memory_space<vmem>>, vector<8x64xf32>
    tpu.vector_store %arg12[%63, %c0_27], %62 {strides = array<i32>} : memref<64x64xf32, #tpu.memory_space<vmem>>, vector<8x64xf32>,
    %c2_i32 = arith.constant 2 : i32
    %c8_i32_28 = arith.constant 8 : i32
    %65 = arith.muli %c2_i32, %c8_i32_28 : i32
    %66 = tpu.assume_multiple %65, 8 : i32
    %67 = arith.index_cast %66 : i32 to index
    %c0_29 = arith.constant 0 : index
    %68 = vector.load %arg11[%67, %c0_29] : memref<64x256xf32, #tpu.memory_space<vmem>>, vector<8x256xf32>
    %69 = arith.truncf %62 : vector<8x64xf32> to vector<8x64xbf16>
    %c0_30 = arith.constant 0 : index
    %c0_31 = arith.constant 0 : index
    %70 = vector.load %arg4[%c0_30, %c0_31] : memref<64x256xbf16, #tpu.memory_space<vmem>>, vector<64x256xbf16>
    %cst_32 = arith.constant dense<0.000000e+00> : vector<8x256xf32>
    %71 = tpu.matmul %69, %70, %cst_32 {dimension_numbers = #tpu.dot_dimension_numbers<[1], [0], [0], [1], [0, 0, 1, 1], [], []>} : vector<8x64xbf16>, vector<64x256xbf16>, vector<8x256xf32> -> vector<8x256xf32>
    %72 = arith.addf %68, %71 : vector<8x256xf32>
    %73 = arith.negf %72 : vector<8x256xf32>
    %74 = math.exp %73 : vector<8x256xf32>
    %cst_33 = arith.constant 1.000000e+00 : f32
    %75 = vector.broadcast %cst_33 : f32 to vector<8x256xf32>
    %76 = arith.addf %75, %74 : vector<8x256xf32>
    %77 = arith.divf %75, %76 : vector<8x256xf32>
    %78 = vector.extract_strided_slice %77 {offsets = [0, 0], sizes = [8, 64], strides = [1, 1]} : vector<8x256xf32> to vector<8x64xf32>
    %79 = vector.extract_strided_slice %77 {offsets = [0, 64], sizes = [8, 64], strides = [1, 1]} : vector<8x256xf32> to vector<8x64xf32>
    %80 = vector.extract_strided_slice %77 {offsets = [0, 128], sizes = [8, 64], strides = [1, 1]} : vector<8x256xf32> to vector<8x64xf32>
    %81 = vector.extract_strided_slice %77 {offsets = [0, 192], sizes = [8, 64], strides = [1, 1]} : vector<8x256xf32> to vector<8x64xf32>
    %cst_34 = arith.constant 2.000000e+00 : f32
    %82 = vector.broadcast %cst_34 : f32 to vector<8x64xf32>
    %83 = arith.mulf %82, %81 : vector<8x64xf32>
    %cst_35 = arith.constant 1.000000e+00 : f32
    %84 = vector.broadcast %cst_35 : f32 to vector<8x64xf32>
    %85 = arith.subf %83, %84 : vector<8x64xf32>
    %86 = arith.mulf %79, %60 : vector<8x64xf32>
    %87 = arith.mulf %78, %85 : vector<8x64xf32>
    %88 = arith.addf %86, %87 : vector<8x64xf32>
    %89 = math.tanh %88 : vector<8x64xf32>
    %90 = arith.mulf %80, %89 : vector<8x64xf32>
    %91 = arith.index_cast %66 : i32 to index
    %c0_36 = arith.constant 0 : index
    %92 = vector.load %arg12[%91, %c0_36] : memref<64x64xf32, #tpu.memory_space<vmem>>, vector<8x64xf32>
    tpu.vector_store %arg12[%91, %c0_36], %90 {strides = array<i32>} : memref<64x64xf32, #tpu.memory_space<vmem>>, vector<8x64xf32>,
    %c3_i32 = arith.constant 3 : i32
    %c8_i32_37 = arith.constant 8 : i32
    %93 = arith.muli %c3_i32, %c8_i32_37 : i32
    %94 = tpu.assume_multiple %93, 8 : i32
    %95 = arith.index_cast %94 : i32 to index
    %c0_38 = arith.constant 0 : index
    %96 = vector.load %arg11[%95, %c0_38] : memref<64x256xf32, #tpu.memory_space<vmem>>, vector<8x256xf32>
    %97 = arith.truncf %90 : vector<8x64xf32> to vector<8x64xbf16>
    %c0_39 = arith.constant 0 : index
    %c0_40 = arith.constant 0 : index
    %98 = vector.load %arg4[%c0_39, %c0_40] : memref<64x256xbf16, #tpu.memory_space<vmem>>, vector<64x256xbf16>
    %cst_41 = arith.constant dense<0.000000e+00> : vector<8x256xf32>
    %99 = tpu.matmul %97, %98, %cst_41 {dimension_numbers = #tpu.dot_dimension_numbers<[1], [0], [0], [1], [0, 0, 1, 1], [], []>} : vector<8x64xbf16>, vector<64x256xbf16>, vector<8x256xf32> -> vector<8x256xf32>
    %100 = arith.addf %96, %99 : vector<8x256xf32>
    %101 = arith.negf %100 : vector<8x256xf32>
    %102 = math.exp %101 : vector<8x256xf32>
    %cst_42 = arith.constant 1.000000e+00 : f32
    %103 = vector.broadcast %cst_42 : f32 to vector<8x256xf32>
    %104 = arith.addf %103, %102 : vector<8x256xf32>
    %105 = arith.divf %103, %104 : vector<8x256xf32>
    %106 = vector.extract_strided_slice %105 {offsets = [0, 0], sizes = [8, 64], strides = [1, 1]} : vector<8x256xf32> to vector<8x64xf32>
    %107 = vector.extract_strided_slice %105 {offsets = [0, 64], sizes = [8, 64], strides = [1, 1]} : vector<8x256xf32> to vector<8x64xf32>
    %108 = vector.extract_strided_slice %105 {offsets = [0, 128], sizes = [8, 64], strides = [1, 1]} : vector<8x256xf32> to vector<8x64xf32>
    %109 = vector.extract_strided_slice %105 {offsets = [0, 192], sizes = [8, 64], strides = [1, 1]} : vector<8x256xf32> to vector<8x64xf32>
    %cst_43 = arith.constant 2.000000e+00 : f32
    %110 = vector.broadcast %cst_43 : f32 to vector<8x64xf32>
    %111 = arith.mulf %110, %109 : vector<8x64xf32>
    %cst_44 = arith.constant 1.000000e+00 : f32
    %112 = vector.broadcast %cst_44 : f32 to vector<8x64xf32>
    %113 = arith.subf %111, %112 : vector<8x64xf32>
    %114 = arith.mulf %107, %88 : vector<8x64xf32>
    %115 = arith.mulf %106, %113 : vector<8x64xf32>
    %116 = arith.addf %114, %115 : vector<8x64xf32>
    %117 = math.tanh %116 : vector<8x64xf32>
    %118 = arith.mulf %108, %117 : vector<8x64xf32>
    %119 = arith.index_cast %94 : i32 to index
    %c0_45 = arith.constant 0 : index
    %120 = vector.load %arg12[%119, %c0_45] : memref<64x64xf32, #tpu.memory_space<vmem>>, vector<8x64xf32>
    tpu.vector_store %arg12[%119, %c0_45], %118 {strides = array<i32>} : memref<64x64xf32, #tpu.memory_space<vmem>>, vector<8x64xf32>,
    %c4_i32 = arith.constant 4 : i32
    %c8_i32_46 = arith.constant 8 : i32
    %121 = arith.muli %c4_i32, %c8_i32_46 : i32
    %122 = tpu.assume_multiple %121, 8 : i32
    %123 = arith.index_cast %122 : i32 to index
    %c0_47 = arith.constant 0 : index
    %124 = vector.load %arg11[%123, %c0_47] : memref<64x256xf32, #tpu.memory_space<vmem>>, vector<8x256xf32>
    %125 = arith.truncf %118 : vector<8x64xf32> to vector<8x64xbf16>
    %c0_48 = arith.constant 0 : index
    %c0_49 = arith.constant 0 : index
    %126 = vector.load %arg4[%c0_48, %c0_49] : memref<64x256xbf16, #tpu.memory_space<vmem>>, vector<64x256xbf16>
    %cst_50 = arith.constant dense<0.000000e+00> : vector<8x256xf32>
    %127 = tpu.matmul %125, %126, %cst_50 {dimension_numbers = #tpu.dot_dimension_numbers<[1], [0], [0], [1], [0, 0, 1, 1], [], []>} : vector<8x64xbf16>, vector<64x256xbf16>, vector<8x256xf32> -> vector<8x256xf32>
    %128 = arith.addf %124, %127 : vector<8x256xf32>
    %129 = arith.negf %128 : vector<8x256xf32>
    %130 = math.exp %129 : vector<8x256xf32>
    %cst_51 = arith.constant 1.000000e+00 : f32
    %131 = vector.broadcast %cst_51 : f32 to vector<8x256xf32>
    %132 = arith.addf %131, %130 : vector<8x256xf32>
    %133 = arith.divf %131, %132 : vector<8x256xf32>
    %134 = vector.extract_strided_slice %133 {offsets = [0, 0], sizes = [8, 64], strides = [1, 1]} : vector<8x256xf32> to vector<8x64xf32>
    %135 = vector.extract_strided_slice %133 {offsets = [0, 64], sizes = [8, 64], strides = [1, 1]} : vector<8x256xf32> to vector<8x64xf32>
    %136 = vector.extract_strided_slice %133 {offsets = [0, 128], sizes = [8, 64], strides = [1, 1]} : vector<8x256xf32> to vector<8x64xf32>
    %137 = vector.extract_strided_slice %133 {offsets = [0, 192], sizes = [8, 64], strides = [1, 1]} : vector<8x256xf32> to vector<8x64xf32>
    %cst_52 = arith.constant 2.000000e+00 : f32
    %138 = vector.broadcast %cst_52 : f32 to vector<8x64xf32>
    %139 = arith.mulf %138, %137 : vector<8x64xf32>
    %cst_53 = arith.constant 1.000000e+00 : f32
    %140 = vector.broadcast %cst_53 : f32 to vector<8x64xf32>
    %141 = arith.subf %139, %140 : vector<8x64xf32>
    %142 = arith.mulf %135, %116 : vector<8x64xf32>
    %143 = arith.mulf %134, %141 : vector<8x64xf32>
    %144 = arith.addf %142, %143 : vector<8x64xf32>
    %145 = math.tanh %144 : vector<8x64xf32>
    %146 = arith.mulf %136, %145 : vector<8x64xf32>
    %147 = arith.index_cast %122 : i32 to index
    %c0_54 = arith.constant 0 : index
    %148 = vector.load %arg12[%147, %c0_54] : memref<64x64xf32, #tpu.memory_space<vmem>>, vector<8x64xf32>
    tpu.vector_store %arg12[%147, %c0_54], %146 {strides = array<i32>} : memref<64x64xf32, #tpu.memory_space<vmem>>, vector<8x64xf32>,
    %c5_i32 = arith.constant 5 : i32
    %c8_i32_55 = arith.constant 8 : i32
    %149 = arith.muli %c5_i32, %c8_i32_55 : i32
    %150 = tpu.assume_multiple %149, 8 : i32
    %151 = arith.index_cast %150 : i32 to index
    %c0_56 = arith.constant 0 : index
    %152 = vector.load %arg11[%151, %c0_56] : memref<64x256xf32, #tpu.memory_space<vmem>>, vector<8x256xf32>
    %153 = arith.truncf %146 : vector<8x64xf32> to vector<8x64xbf16>
    %c0_57 = arith.constant 0 : index
    %c0_58 = arith.constant 0 : index
    %154 = vector.load %arg4[%c0_57, %c0_58] : memref<64x256xbf16, #tpu.memory_space<vmem>>, vector<64x256xbf16>
    %cst_59 = arith.constant dense<0.000000e+00> : vector<8x256xf32>
    %155 = tpu.matmul %153, %154, %cst_59 {dimension_numbers = #tpu.dot_dimension_numbers<[1], [0], [0], [1], [0, 0, 1, 1], [], []>} : vector<8x64xbf16>, vector<64x256xbf16>, vector<8x256xf32> -> vector<8x256xf32>
    %156 = arith.addf %152, %155 : vector<8x256xf32>
    %157 = arith.negf %156 : vector<8x256xf32>
    %158 = math.exp %157 : vector<8x256xf32>
    %cst_60 = arith.constant 1.000000e+00 : f32
    %159 = vector.broadcast %cst_60 : f32 to vector<8x256xf32>
    %160 = arith.addf %159, %158 : vector<8x256xf32>
    %161 = arith.divf %159, %160 : vector<8x256xf32>
    %162 = vector.extract_strided_slice %161 {offsets = [0, 0], sizes = [8, 64], strides = [1, 1]} : vector<8x256xf32> to vector<8x64xf32>
    %163 = vector.extract_strided_slice %161 {offsets = [0, 64], sizes = [8, 64], strides = [1, 1]} : vector<8x256xf32> to vector<8x64xf32>
    %164 = vector.extract_strided_slice %161 {offsets = [0, 128], sizes = [8, 64], strides = [1, 1]} : vector<8x256xf32> to vector<8x64xf32>
    %165 = vector.extract_strided_slice %161 {offsets = [0, 192], sizes = [8, 64], strides = [1, 1]} : vector<8x256xf32> to vector<8x64xf32>
    %cst_61 = arith.constant 2.000000e+00 : f32
    %166 = vector.broadcast %cst_61 : f32 to vector<8x64xf32>
    %167 = arith.mulf %166, %165 : vector<8x64xf32>
    %cst_62 = arith.constant 1.000000e+00 : f32
    %168 = vector.broadcast %cst_62 : f32 to vector<8x64xf32>
    %169 = arith.subf %167, %168 : vector<8x64xf32>
    %170 = arith.mulf %163, %144 : vector<8x64xf32>
    %171 = arith.mulf %162, %169 : vector<8x64xf32>
    %172 = arith.addf %170, %171 : vector<8x64xf32>
    %173 = math.tanh %172 : vector<8x64xf32>
    %174 = arith.mulf %164, %173 : vector<8x64xf32>
    %175 = arith.index_cast %150 : i32 to index
    %c0_63 = arith.constant 0 : index
    %176 = vector.load %arg12[%175, %c0_63] : memref<64x64xf32, #tpu.memory_space<vmem>>, vector<8x64xf32>
    tpu.vector_store %arg12[%175, %c0_63], %174 {strides = array<i32>} : memref<64x64xf32, #tpu.memory_space<vmem>>, vector<8x64xf32>,
    %c6_i32 = arith.constant 6 : i32
    %c8_i32_64 = arith.constant 8 : i32
    %177 = arith.muli %c6_i32, %c8_i32_64 : i32
    %178 = tpu.assume_multiple %177, 8 : i32
    %179 = arith.index_cast %178 : i32 to index
    %c0_65 = arith.constant 0 : index
    %180 = vector.load %arg11[%179, %c0_65] : memref<64x256xf32, #tpu.memory_space<vmem>>, vector<8x256xf32>
    %181 = arith.truncf %174 : vector<8x64xf32> to vector<8x64xbf16>
    %c0_66 = arith.constant 0 : index
    %c0_67 = arith.constant 0 : index
    %182 = vector.load %arg4[%c0_66, %c0_67] : memref<64x256xbf16, #tpu.memory_space<vmem>>, vector<64x256xbf16>
    %cst_68 = arith.constant dense<0.000000e+00> : vector<8x256xf32>
    %183 = tpu.matmul %181, %182, %cst_68 {dimension_numbers = #tpu.dot_dimension_numbers<[1], [0], [0], [1], [0, 0, 1, 1], [], []>} : vector<8x64xbf16>, vector<64x256xbf16>, vector<8x256xf32> -> vector<8x256xf32>
    %184 = arith.addf %180, %183 : vector<8x256xf32>
    %185 = arith.negf %184 : vector<8x256xf32>
    %186 = math.exp %185 : vector<8x256xf32>
    %cst_69 = arith.constant 1.000000e+00 : f32
    %187 = vector.broadcast %cst_69 : f32 to vector<8x256xf32>
    %188 = arith.addf %187, %186 : vector<8x256xf32>
    %189 = arith.divf %187, %188 : vector<8x256xf32>
    %190 = vector.extract_strided_slice %189 {offsets = [0, 0], sizes = [8, 64], strides = [1, 1]} : vector<8x256xf32> to vector<8x64xf32>
    %191 = vector.extract_strided_slice %189 {offsets = [0, 64], sizes = [8, 64], strides = [1, 1]} : vector<8x256xf32> to vector<8x64xf32>
    %192 = vector.extract_strided_slice %189 {offsets = [0, 128], sizes = [8, 64], strides = [1, 1]} : vector<8x256xf32> to vector<8x64xf32>
    %193 = vector.extract_strided_slice %189 {offsets = [0, 192], sizes = [8, 64], strides = [1, 1]} : vector<8x256xf32> to vector<8x64xf32>
    %cst_70 = arith.constant 2.000000e+00 : f32
    %194 = vector.broadcast %cst_70 : f32 to vector<8x64xf32>
    %195 = arith.mulf %194, %193 : vector<8x64xf32>
    %cst_71 = arith.constant 1.000000e+00 : f32
    %196 = vector.broadcast %cst_71 : f32 to vector<8x64xf32>
    %197 = arith.subf %195, %196 : vector<8x64xf32>
    %198 = arith.mulf %191, %172 : vector<8x64xf32>
    %199 = arith.mulf %190, %197 : vector<8x64xf32>
    %200 = arith.addf %198, %199 : vector<8x64xf32>
    %201 = math.tanh %200 : vector<8x64xf32>
    %202 = arith.mulf %192, %201 : vector<8x64xf32>
    %203 = arith.index_cast %178 : i32 to index
    %c0_72 = arith.constant 0 : index
    %204 = vector.load %arg12[%203, %c0_72] : memref<64x64xf32, #tpu.memory_space<vmem>>, vector<8x64xf32>
    tpu.vector_store %arg12[%203, %c0_72], %202 {strides = array<i32>} : memref<64x64xf32, #tpu.memory_space<vmem>>, vector<8x64xf32>,
    %c7_i32 = arith.constant 7 : i32
    %c8_i32_73 = arith.constant 8 : i32
    %205 = arith.muli %c7_i32, %c8_i32_73 : i32
    %206 = tpu.assume_multiple %205, 8 : i32
    %207 = arith.index_cast %206 : i32 to index
    %c0_74 = arith.constant 0 : index
    %208 = vector.load %arg11[%207, %c0_74] : memref<64x256xf32, #tpu.memory_space<vmem>>, vector<8x256xf32>
    %209 = arith.truncf %202 : vector<8x64xf32> to vector<8x64xbf16>
    %c0_75 = arith.constant 0 : index
    %c0_76 = arith.constant 0 : index
    %210 = vector.load %arg4[%c0_75, %c0_76] : memref<64x256xbf16, #tpu.memory_space<vmem>>, vector<64x256xbf16>
    %cst_77 = arith.constant dense<0.000000e+00> : vector<8x256xf32>
    %211 = tpu.matmul %209, %210, %cst_77 {dimension_numbers = #tpu.dot_dimension_numbers<[1], [0], [0], [1], [0, 0, 1, 1], [], []>} : vector<8x64xbf16>, vector<64x256xbf16>, vector<8x256xf32> -> vector<8x256xf32>
    %212 = arith.addf %208, %211 : vector<8x256xf32>
    %213 = arith.negf %212 : vector<8x256xf32>
    %214 = math.exp %213 : vector<8x256xf32>
    %cst_78 = arith.constant 1.000000e+00 : f32
    %215 = vector.broadcast %cst_78 : f32 to vector<8x256xf32>
    %216 = arith.addf %215, %214 : vector<8x256xf32>
    %217 = arith.divf %215, %216 : vector<8x256xf32>
    %218 = vector.extract_strided_slice %217 {offsets = [0, 0], sizes = [8, 64], strides = [1, 1]} : vector<8x256xf32> to vector<8x64xf32>
    %219 = vector.extract_strided_slice %217 {offsets = [0, 64], sizes = [8, 64], strides = [1, 1]} : vector<8x256xf32> to vector<8x64xf32>
    %220 = vector.extract_strided_slice %217 {offsets = [0, 128], sizes = [8, 64], strides = [1, 1]} : vector<8x256xf32> to vector<8x64xf32>
    %221 = vector.extract_strided_slice %217 {offsets = [0, 192], sizes = [8, 64], strides = [1, 1]} : vector<8x256xf32> to vector<8x64xf32>
    %cst_79 = arith.constant 2.000000e+00 : f32
    %222 = vector.broadcast %cst_79 : f32 to vector<8x64xf32>
    %223 = arith.mulf %222, %221 : vector<8x64xf32>
    %cst_80 = arith.constant 1.000000e+00 : f32
    %224 = vector.broadcast %cst_80 : f32 to vector<8x64xf32>
    %225 = arith.subf %223, %224 : vector<8x64xf32>
    %226 = arith.mulf %219, %200 : vector<8x64xf32>
    %227 = arith.mulf %218, %225 : vector<8x64xf32>
    %228 = arith.addf %226, %227 : vector<8x64xf32>
    %229 = math.tanh %228 : vector<8x64xf32>
    %230 = arith.mulf %220, %229 : vector<8x64xf32>
    %231 = arith.index_cast %206 : i32 to index
    %c0_81 = arith.constant 0 : index
    %232 = vector.load %arg12[%231, %c0_81] : memref<64x64xf32, #tpu.memory_space<vmem>>, vector<8x64xf32>
    tpu.vector_store %arg12[%231, %c0_81], %230 {strides = array<i32>} : memref<64x64xf32, #tpu.memory_space<vmem>>, vector<8x64xf32>,
    %c8_i32_82 = arith.constant 8 : i32
    %c0_83 = arith.constant 0 : index
    %c0_84 = arith.constant 0 : index
    %233 = vector.load %arg9[%c0_83, %c0_84] : memref<8x64xf32, #tpu.memory_space<vmem>>, vector<8x64xf32>
    tpu.vector_store %arg9[%c0_83, %c0_84], %230 {strides = array<i32>} : memref<8x64xf32, #tpu.memory_space<vmem>>, vector<8x64xf32>,
    %c0_85 = arith.constant 0 : index
    %c0_86 = arith.constant 0 : index
    %234 = vector.load %arg10[%c0_85, %c0_86] : memref<8x64xf32, #tpu.memory_space<vmem>>, vector<8x64xf32>
    tpu.vector_store %arg10[%c0_85, %c0_86], %228 {strides = array<i32>} : memref<8x64xf32, #tpu.memory_space<vmem>>, vector<8x64xf32>,
    %c0_87 = arith.constant 0 : index
    %c0_88 = arith.constant 0 : index
    %235 = vector.load %arg12[%c0_87, %c0_88] : memref<64x64xf32, #tpu.memory_space<vmem>>, vector<64x64xf32>
    %236 = arith.truncf %235 : vector<64x64xf32> to vector<64x64xbf16>
    %c0_89 = arith.constant 0 : index
    %c0_90 = arith.constant 0 : index
    %237 = vector.load %arg6[%c0_89, %c0_90] : memref<64x128xbf16, #tpu.memory_space<vmem>>, vector<64x128xbf16>
    %cst_91 = arith.constant dense<0.000000e+00> : vector<64x128xf32>
    %238 = tpu.matmul %236, %237, %cst_91 {dimension_numbers = #tpu.dot_dimension_numbers<[1], [0], [0], [1], [0, 0, 1, 1], [], []>} : vector<64x64xbf16>, vector<64x128xbf16>, vector<64x128xf32> -> vector<64x128xf32>
    %c0_92 = arith.constant 0 : index
    %c0_93 = arith.constant 0 : index
    %239 = vector.load %arg7[%c0_92, %c0_93] : memref<1x128xf32, #tpu.memory_space<vmem>>, vector<1x128xf32>
    %240 = vector.broadcast %239 : vector<1x128xf32> to vector<64x128xf32>
    %241 = arith.addf %238, %240 : vector<64x128xf32>
    %c0_94 = arith.constant 0 : index
    %c0_95 = arith.constant 0 : index
    %242 = vector.load %arg8[%c0_94, %c0_95] : memref<64x128xf32, #tpu.memory_space<vmem>>, vector<64x128xf32>
    tpu.vector_store %arg8[%c0_94, %c0_95], %241 {strides = array<i32>} : memref<64x128xf32, #tpu.memory_space<vmem>>, vector<64x128xf32>,
    return
  }
}

</mosaic_0001>

<bundles_post_ra>
// kernel: detector_forward.1
= control target key start
LH: loop header
LB: loop body
LE: loop exit
PB: predicated region body
PF: predicated region fallthrough
CT: control target
= control target key end

     0   :  { %16 = vsyncpa [#allocation5], 0  ;;  %s1813_s13 = smov [#allocation4]   ;;  %s2183_s0 = inlined_call_operand.vmem [shape: bf16[64,128], index: 0, kind: input, shape index: {}]   ;;  %s2184_s1 = inlined_call_operand.vmem [shape: f32[8,64], index: 1, kind: input, shape index: {}]   ;;  %s2185_s2 = inlined_call_operand.vmem [shape: f32[8,64], index: 2, kind: input, shape index: {}]   ;;  %s2186_s3 = inlined_call_operand.hbm [shape: bf16[128,256], index: 3, kind: input, shape index: {}]   ;;  %s2187_s4 = inlined_call_operand.vmem [shape: bf16[64,256], index: 4, kind: input, shape index: {}]   ;;  %s2188_s5 = inlined_call_operand.vmem [shape: f32[1,256], index: 5, kind: input, shape index: {}]   ;;  %s2189_s6 = inlined_call_operand.vmem [shape: bf16[64,128], index: 6, kind: input, shape index: {}]   ;;  %s2190_s7 = inlined_call_operand.vmem [shape: f32[1,128], index: 7, kind: input, shape index: {}]   ;;  %s2191_s8 = inlined_call_operand.vmem [shape: f32[64,128], index: 8, kind: output, shape index: {0}]   ;;  %s2192_s9 = inlined_call_operand.vmem [shape: f32[8,64], index: 9, kind: output, shape index: {1}]   ;;  %s2193_s10 = inlined_call_operand.vmem [shape: f32[8,64], index: 10, kind: output, shape index: {2}]  }
   0x1   :  { %s28_s14 = sshll.u32 %s1813_s13, 4  ;;  %s1789_s17 = scalar_lea.hbm %s2186_s3, 2048  ;;  %s29_s14 = int_to_ptr.vmem [resolvable:$true] %s28_s14 }
   0x2   :  { %p1790_p0 = scmp.ne.s32.totalorder %s2186_s3, %s1789_s17  ;;  %p1793_p1 = scmp.lt.u32.totalorder %s1789_s17, %s2186_s3 }
   0x4   :  { %p1795_p2 = pnand %p1793_p1, %p1790_p0 }
   0x6   :  { %1798 = shalt.err (!%p1795_p2)
}
   0x7   :  { %s1799_s22 = scalar_lea.vmem %s29_s14, 2048  ;;  %p1804_p4 = scmp.lt.s32.totalorder %s29_s14, %s29_s14 }
   0x8   :  { %p1800_p3 = scmp.ne.s32.totalorder %s29_s14, %s1799_s22  ;;  %p1805_p5 = scmp.lt.s32.totalorder %s1799_s22, %s1799_s22 }
   0xa   :  { %p1806_p6 = por %p1805_p5, %p1804_p4 }
   0xc   :  { %p1807_p7 = pnand %p1806_p6, %p1800_p3 }
   0xe   :  { %1810 = shalt.err (!%p1807_p7)
}
   0xf   :  { %s1814_s23 = smov 128   ;;  %s1815_s24 = smov 8  }
  0x10   :  { %34 = dma.hbm_to_vmem [thread:$0]  %s2186_s3, 2048, %s29_s14, [#allocation5], %s1814_s23, %s1814_s23, %s1815_s24  }
  0x11   :  { %1811 = dma.done.wait [#allocation5], 2048  }
  0x12   :  { %1812 = vsyncadd [#allocation5], 4294965248  ;;  %v1816_v0 = vmov 0   ;;  %v1662_v1 = vld [vmem:[#allocation4 + $0x4] ss:$8 sps:$4 sm:$0xff]   ;;  %vm332_vm0 = vcmask 523264   ;;  %v73_v28 = vlaneseq }
  0x13   :  { %368 = vmatprep.mubr.bf16.mxu1 %v1816_v0  ;;  %219 = vmatprep.mubr.bf16.mxu0 %v1816_v0  ;;  %v1664_v2 = vld [vmem:[#allocation4] ss:$8 sps:$4 sm:$0xff]   ;;  %v1665_v3 = vld [vmem:[#allocation4 + $0x14] ss:$8 sps:$4 sm:$0xff]   ;;  %v1667_v4 = vld [vmem:[#allocation4 + $0x10] ss:$8 sps:$4 sm:$0xff]  }
  0x14   :  { %187 = vmatprep.subr.bf16.mxu0 %v1662_v1  ;;  %v1668_v5 = vld [vmem:[#allocation4 + $0x24] ss:$8 sps:$4 sm:$0xff]   ;;  %v1670_v7 = vld [vmem:[#allocation4 + $0x20] ss:$8 sps:$4 sm:$0xff]   ;;  %v1671_v8 = vld [vmem:[#allocation4 + $0x34] ss:$8 sps:$4 sm:$0xff]  }
  0x15   :  { %188 = vmatpush1.bf16.msra.mxu0 %v1664_v2  ;;  %v1890_v6 = vld [vmem:[%s2187_s4 + $0x4] ss:$8 sps:$4 sm:$0xff]   ;;  %v1895_v9 = vld [vmem:[%s2187_s4] ss:$8 sps:$4 sm:$0xff]   ;;  %v1901_v10 = vld [vmem:[%s2187_s4 + $0x14] ss:$8 sps:$4 sm:$0xff]  }
  0x16   :  { %189 = vmatprep.subr.bf16.mxu0 %v1665_v3  ;;  %336 = vmatprep.subr.bf16.mxu1 %v1890_v6  ;;  %v1673_v11 = vld [vmem:[#allocation4 + $0x30] ss:$8 sps:$4 sm:$0xff]   ;;  %v1913_v13 = vld [vmem:[%s2187_s4 + $0x24] ss:$8 sps:$4 sm:$0xff]   ;;  %v1919_v15 = vld [vmem:[%s2187_s4 + $0x20] ss:$8 sps:$4 sm:$0xff]  }
  0x17   :  { %337 = vmatpush1.bf16.msra.mxu1 %v1895_v9  ;;  %v1908_v12 = vld [vmem:[%s2187_s4 + $0x10] ss:$8 sps:$4 sm:$0xff]   ;;  %v1676_v14 = vld [vmem:[#allocation4 + $0x44] ss:$8 sps:$4 sm:$0xff]   ;;  %v1925_v16 = vld [vmem:[%s2187_s4 + $0x34] ss:$8 sps:$4 sm:$0xff]  }
  0x18   :  { %338 = vmatprep.subr.bf16.mxu1 %v1901_v10  ;;  %v1679_v17 = vld [vmem:[#allocation4 + $0x40] ss:$8 sps:$4 sm:$0xff]   ;;  %v1682_v18 = vld [vmem:[#allocation4 + $0x54] ss:$8 sps:$4 sm:$0xff]   ;;  %v1930_v19 = vld [vmem:[%s2187_s4 + $0x30] ss:$8 sps:$4 sm:$0xff]  }
  0x19   :  { %190 = vmatpush1.bf16.msra.mxu0 %v1667_v4  ;;  %v1685_v20 = vld [vmem:[#allocation4 + $0x50] ss:$8 sps:$4 sm:$0xff]   ;;  %v276_v21 = vld [vmem:[%s2184_s1] sm:$0xff]  ;;  %v1694_v25 = vld [vmem:[#allocation4 + $0x74] ss:$8 sps:$4 sm:$0xff]   ;;  %v74_v29 = vshrl.u32 %v73_v28, 7 }
  0x1a   :  { %191 = vmatprep.subr.bf16.mxu0 %v1668_v5  ;;  %v1688_v22 = vld [vmem:[#allocation4 + $0x64] ss:$8 sps:$4 sm:$0xff]   ;;  %v283_v23 = vpack.c.bf16 %v276_v21, %v276_v21  ;;  %v1691_v24 = vld [vmem:[#allocation4 + $0x60] ss:$8 sps:$4 sm:$0xff]   ;;  %v1697_v26 = vld [vmem:[#allocation4 + $0x70] ss:$8 sps:$4 sm:$0xff]  }
  0x1b   :  { %339 = vmatpush1.bf16.msra.mxu1 %v1908_v12  ;;  %v1698_v27 = vld [vmem:[%s2183_s0] sm:$0xff]   ;;  %v75_v31 = vsub.s32 0, %v74_v29  ;;  %v79_v37 = vsub.s32 1, %v74_v29 }
  0x1c   :  { %340 = vmatprep.subr.bf16.mxu1 %v1913_v13  ;;  %v71_v30 = vld [vmem:[%s2188_s5] sm:$0x3]  ;;  %s1817_s5 = smov 64  }
  0x1d   :  { %192 = vmatpush1.bf16.msra.mxu0 %v1670_v7  ;;  %v1965_v32 = vrot.slane %v71_v30, %v75_v31  ;;  %v1967_v38 = vrot.slane %v71_v30, %v79_v37  ;;  %v277_v53 = vld [vmem:[%s2185_s2] sm:$0xff] }
  0x1e   :  { %193 = vmatprep.subr.bf16.mxu0 %v1671_v8 }
  0x1f   :  { %341 = vmatpush1.bf16.msra.mxu1 %v1919_v15 }
  0x20   :  { %342 = vmatprep.subr.bf16.mxu1 %v1925_v16 }
  0x21   :  { %194 = vmatpush1.bf16.msra.mxu0 %v1673_v11 }
  0x22   :  { %195 = vmatprep.subr.bf16.mxu0 %v1676_v14 }
  0x23   :  { %343 = vmatpush1.bf16.msra.mxu1 %v1930_v19 }
  0x24   :  { %472 = vmatprep.subr.bf16.mxu1 %v1890_v6 }
  0x25   :  { %196 = vmatpush1.bf16.msra.mxu0 %v1679_v17 }
  0x26   :  { %197 = vmatprep.subr.bf16.mxu0 %v1682_v18  ;;  %1536 = vmatmul.mubr.msk.bf16.vlgmr.msra.gmra.mrb[0].mxu1 %vm332_vm0, %v283_v23 }
  0x27   :  { %473 = vmatpush1.bf16.msra.mxu1 %v1895_v9  ;;  %504 = vmatprep.mubr.bf16.mxu1 %v1816_v0 }
  0x28   :  { %474 = vmatprep.subr.bf16.mxu1 %v1901_v10 }
  0x29   :  { %198 = vmatpush1.bf16.msra.mxu0 %v1685_v20 }
  0x2a   :  { %199 = vmatprep.subr.bf16.mxu0 %v1688_v22 }
  0x2b   :  { %475 = vmatpush1.bf16.msra.mxu1 %v1908_v12 }
  0x2c   :  { %476 = vmatprep.subr.bf16.mxu1 %v1913_v13 }
  0x2d   :  { %200 = vmatpush1.bf16.msra.mxu0 %v1691_v24 }
  0x2e   :  { %201 = vmatprep.subr.bf16.mxu0 %v1694_v25 }
  0x2f   :  { %477 = vmatpush1.bf16.msra.mxu1 %v1919_v15 }
  0x30   :  { %478 = vmatprep.subr.bf16.mxu1 %v1925_v16 }
  0x31   :  { %202 = vmatpush1.bf16.msra.mxu0 %v1697_v26 }
  0x32   :  { %738 = vmatprep.subr.bf16.mxu0 %v1890_v6 }
  0x33   :  { %479 = vmatpush1.bf16.msra.mxu1 %v1930_v19 }
  0x34   :  { %220 = vmatmul.mubr.bf16.vlgmr.msra.gmra.mrb[0].mxu0 %v1698_v27  ;;  %605 = vmatprep.subr.bf16.mxu1 %v1890_v6 }
  0x35   :  { %229 = vmatprep.mubr.bf16.mxu0 %v1816_v0  ;;  %739 = vmatpush1.bf16.msra.mxu0 %v1895_v9 }
  0x36   :  { %740 = vmatprep.subr.bf16.mxu0 %v1901_v10 }
  0x39   :  { %741 = vmatpush1.bf16.msra.mxu0 %v1908_v12 }
  0x3a   :  { %742 = vmatprep.subr.bf16.mxu0 %v1913_v13 }
  0x3d   :  { %743 = vmatpush1.bf16.msra.mxu0 %v1919_v15 }
  0x3e   :  { %744 = vmatprep.subr.bf16.mxu0 %v1925_v16 }
  0x41   :  { %745 = vmatpush1.bf16.msra.mxu0 %v1930_v19 }
  0x42   :  { %1004 = vmatprep.subr.bf16.mxu0 %v1890_v6 }
  0xf9   :  { %v370_v33 = vpop.f32.mrb[0].mxu1 }
  0xfa   :  { %v372_v34 = vpop.f32.mrb[1].mxu1 }
  0xfb   :  { %v374_v35 = vpop.f32.mrb[2].mxu1 }
  0xfc   :  { %v375_v36 = vpop.f32.mrb[3].mxu1 }
 0x107   :  { %v221_v39 = vpop.f32.mrb[0].mxu0 }
 0x108   :  { %v222_v40 = vadd.f32 %v221_v39, %v1965_v32  ;;  %v223_v41 = vpop.f32.mrb[1].mxu0 }
 0x109   :  { %v224_v42 = vadd.f32 %v223_v41, %v1967_v38  ;;  %v225_v43 = vpop.f32.mrb[2].mxu0 }
 0x10a   :  { %v377_v44 = vadd.f32 %v370_v33, %v222_v40  ;;  %v227_v45 = vpop.f32.mrb[3].mxu0  ;;  %v226_v5 = vadd.f32 %v225_v43, %v1965_v32 }
 0x10b   :  { %v378_v46 = vadd.f32 %v372_v34, %v224_v42  ;;  %v228_v7 = vadd.f32 %v227_v45, %v1967_v38  ;;  %v1699_v34 = vld [vmem:[%s2183_s0 + $0x8] sm:$0xff]  }
 0x10c   :  { %v1537_v54 = vmul.f32 -1.442695, %v377_v44  ;;  %230 = vmatmul.mubr.bf16.gmra.mrb[4].mxu0 %v1699_v34 }
 0x10d   :  { %v1538_v47 = vmul.f32 -1.442695, %v378_v46  ;;  %239 = vmatprep.mubr.bf16.mxu0 %v1816_v0 }
 0x10f   :  { %1709 = vpow2.f32 %v1538_v47 }
 0x119   :  { %v1710_v48 = vpop.eup %1709 }
 0x11a   :  { %v386_v49 = vadd.f32 1.0, %v1710_v48 }
 0x11c   :  { %1711 = vrcp.f32 %v386_v49 }
 0x11d   :  { %1713 = vpow2.f32 %v1537_v54 }
 0x126   :  { %v1712_v50 = vpop.eup %1711 }
 0x127   :  { %v391_v51 = vmul.f32 2.0, %v1712_v50  ;;  %v1714_v55 = vpop.eup %1713 }
 0x128   :  { %v385_v56 = vadd.f32 1.0, %v1714_v55 }
 0x129   :  { %v1539_v52 = vadd.f32 -1.0, %v391_v51 }
 0x12a   :  { %1715 = vrcp.f32 %v385_v56 }
 0x12b   :  { %399 = vrot.lane.b32.xlu0 %v1539_v52, %s1817_s5 }
 0x12f   :  { %394 = vrot.lane.b32.xlu0 %v277_v53, %s1817_s5 }
 0x134   :  { %v1716_v57 = vpop.eup %1715 }
 0x19d   :  { %v400_v58 = vpop.permute.xlu0 %399 }
 0x19e   :  { %v402_v59 = vmul.f32 %v1716_v57, %v400_v58 }
 0x1a0   :  { %404 = vrot.lane.b32.xlu1 %v402_v59, %s1817_s5 }
 0x1a1   :  { %v395_v60 = vpop.permute.xlu0 %394 }
 0x1a2   :  { %v397_v61 = vmul.f32 %v1716_v57, %v395_v60 }
 0x1df   :  { %v231_v40 = vpop.f32.mrb[4].mxu0 }
 0x1e0   :  { %v233_v41 = vpop.f32.mrb[5].mxu0  ;;  %v232_v47 = vadd.f32 %v231_v40, %v1965_v32 }
 0x1e1   :  { %v1998_v42 = vpop.f32.mrb[6].mxu0  ;;  %v234_v48 = vadd.f32 %v233_v41, %v1967_v38 }
 0x1e2   :  { %v2000_v43 = vpop.f32.mrb[7].mxu0 }
 0x212   :  { %v405_v62 = vpop.permute.xlu1 %404 }
 0x213   :  { %v407_v63 = vadd.f32 %v405_v62, %v397_v61 }
 0x215   :  { %1717 = vtanh.f32 %v407_v63 }
 0x21f   :  { %v1718_v1 = vpop.eup %1717 }
 0x220   :  { %410 = vrot.lane.b32.xlu1 %v1718_v1, %s1817_s5 }
 0x292   :  { %v411_v2 = vpop.permute.xlu1 %410 }
 0x293   :  { %v413_v3 = vmul.f32 %v1712_v50, %v411_v2 }
 0x295   :  { %414 = vst.msk [vmem:[#allocation3] sm:$0xff] %vm332_vm0, %v413_v3  ;;  %v420_v4 = vpack.c.bf16 %v413_v3, %v413_v3  ;;  %v1700_v3 = vld [vmem:[%s2183_s0 + $0x10] sm:$0xff]  }
 0x296   :  { %240 = vmatmul.mubr.bf16.gmra.mrb[8].mxu0 %v1700_v3 }
 0x297   :  { %1548 = vmatmul.mubr.msk.bf16.vlgmr.msra.gmra.mrb[4].mxu1 %vm332_vm0, %v420_v4  ;;  %249 = vmatprep.mubr.bf16.mxu0 %v1816_v0  ;;  %v1701_v4 = vld [vmem:[%s2183_s0 + $0x18] sm:$0xff]  }
 0x298   :  { %606 = vmatpush1.bf16.msra.mxu1 %v1895_v9  ;;  %637 = vmatprep.mubr.bf16.mxu1 %v1816_v0 }
 0x299   :  { %607 = vmatprep.subr.bf16.mxu1 %v1901_v10 }
 0x29c   :  { %608 = vmatpush1.bf16.msra.mxu1 %v1908_v12 }
 0x29d   :  { %609 = vmatprep.subr.bf16.mxu1 %v1913_v13 }
 0x29e   :  { %250 = vmatmul.mubr.bf16.gmra.mrb[12].mxu0 %v1701_v4 }
 0x29f   :  { %770 = vmatprep.mubr.bf16.mxu0 %v1816_v0 }
 0x2a0   :  { %610 = vmatpush1.bf16.msra.mxu1 %v1919_v15 }
 0x2a1   :  { %611 = vmatprep.subr.bf16.mxu1 %v1925_v16 }
 0x2a4   :  { %612 = vmatpush1.bf16.msra.mxu1 %v1930_v19 }
 0x2a5   :  { %871 = vmatprep.subr.bf16.mxu1 %v1890_v6 }
 0x36a   :  { %v506_v8 = vpop.f32.mrb[4].mxu1 }
 0x36b   :  { %v513_v11 = vadd.f32 %v506_v8, %v226_v5  ;;  %v508_v14 = vpop.f32.mrb[5].mxu1 }
 0x36c   :  { %v514_v17 = vadd.f32 %v508_v14, %v228_v7  ;;  %v510_v18 = vpop.f32.mrb[6].mxu1  ;;  %v2026_v14 = vpop.f32.mrb[8].mxu0 }
 0x36d   :  { %v511_v20 = vpop.f32.mrb[7].mxu1  ;;  %v1549_v27 = vmul.f32 -1.442695, %v513_v11 }
 0x36e   :  { %v1550_v21 = vmul.f32 -1.442695, %v514_v17  ;;  %v2028_v17 = vpop.f32.mrb[9].mxu0 }
 0x36f   :  { %v2030_v18 = vpop.f32.mrb[10].mxu0 }
 0x370   :  { %1719 = vpow2.f32 %v1550_v21  ;;  %v2032_v20 = vpop.f32.mrb[11].mxu0 }
 0x371   :  { %v2034_v21 = vpop.f32.mrb[12].mxu0 }
 0x37a   :  { %v1720_v22 = vpop.eup %1719 }
 0x37b   :  { %v522_v23 = vadd.f32 1.0, %v1720_v22  ;;  %v2036_v22 = vpop.f32.mrb[13].mxu0 }
 0x37d   :  { %1721 = vrcp.f32 %v522_v23  ;;  %v2038_v23 = vpop.f32.mrb[14].mxu0 }
 0x37e   :  { %1723 = vpow2.f32 %v1549_v27 }
 0x387   :  { %v1722_v24 = vpop.eup %1721 }
 0x388   :  { %v527_v25 = vmul.f32 2.0, %v1722_v24  ;;  %v1724_v28 = vpop.eup %1723 }
 0x389   :  { %v521_v29 = vadd.f32 1.0, %v1724_v28  ;;  %v236_v28 = vadd.f32 %v1998_v42, %v1965_v32 }
 0x38a   :  { %v1551_v26 = vadd.f32 -1.0, %v527_v25 }
 0x38b   :  { %1725 = vrcp.f32 %v521_v29  ;;  %v238_v29 = vadd.f32 %v2000_v43, %v1967_v38 }
 0x38c   :  { %531 = vrot.lane.b32.xlu0 %v1551_v26, %s1817_s5 }
 0x395   :  { %v1726_v30 = vpop.eup %1725 }
 0x396   :  { %v529_v35 = vmul.f32 %v1726_v30, %v407_v63 }
 0x3fe   :  { %v532_v31 = vpop.permute.xlu0 %531 }
 0x3ff   :  { %v534_v33 = vmul.f32 %v1726_v30, %v532_v31 }
 0x401   :  { %536 = vrot.lane.b32.xlu1 %v534_v33, %s1817_s5 }
 0x473   :  { %v537_v36 = vpop.permute.xlu1 %536 }
 0x474   :  { %v539_v37 = vadd.f32 %v537_v36, %v529_v35 }
 0x476   :  { %1727 = vtanh.f32 %v539_v37 }
 0x480   :  { %v1728_v39 = vpop.eup %1727 }
 0x481   :  { %542 = vrot.lane.b32.xlu0 %v1728_v39, %s1817_s5 }
 0x4f3   :  { %v543_v44 = vpop.permute.xlu0 %542 }
 0x4f4   :  { %v545_v45 = vmul.f32 %v1722_v24, %v543_v44  ;;  %v2040_v24 = vpop.f32.mrb[15].mxu0 }
 0x4f6   :  { %547 = vst.msk [vmem:[#allocation3 + $0x8] sm:$0xff] %vm332_vm0, %v545_v45  ;;  %v553_v46 = vpack.c.bf16 %v545_v45, %v545_v45 }
 0x4f8   :  { %1560 = vmatmul.mubr.msk.bf16.vlgmr.msra.gmra.mrb[8].mxu1 %vm332_vm0, %v553_v46 }
 0x4f9   :  { %872 = vmatpush1.bf16.msra.mxu1 %v1895_v9  ;;  %903 = vmatprep.mubr.bf16.mxu1 %v1816_v0 }
 0x4fa   :  { %873 = vmatprep.subr.bf16.mxu1 %v1901_v10 }
 0x4fd   :  { %874 = vmatpush1.bf16.msra.mxu1 %v1908_v12 }
 0x4fe   :  { %875 = vmatprep.subr.bf16.mxu1 %v1913_v13 }
 0x501   :  { %876 = vmatpush1.bf16.msra.mxu1 %v1919_v15 }
 0x502   :  { %877 = vmatprep.subr.bf16.mxu1 %v1925_v16 }
 0x505   :  { %878 = vmatpush1.bf16.msra.mxu1 %v1930_v19 }
 0x506   :  { %1137 = vmatprep.subr.bf16.mxu1 %v1890_v6 }
 0x5cb   :  { %v639_v49 = vpop.f32.mrb[8].mxu1 }
 0x5cc   :  { %v646_v50 = vadd.f32 %v639_v49, %v232_v47  ;;  %v641_v51 = vpop.f32.mrb[9].mxu1 }
 0x5cd   :  { %v647_v52 = vadd.f32 %v641_v51, %v234_v48  ;;  %v643_v53 = vpop.f32.mrb[10].mxu1 }
 0x5ce   :  { %v644_v54 = vpop.f32.mrb[11].mxu1  ;;  %v1561_v6 = vmul.f32 -1.442695, %v646_v50 }
 0x5cf   :  { %v1562_v55 = vmul.f32 -1.442695, %v647_v52 }
 0x5d1   :  { %1729 = vpow2.f32 %v1562_v55 }
 0x5db   :  { %v1730_v56 = vpop.eup %1729 }
 0x5dc   :  { %v655_v57 = vadd.f32 1.0, %v1730_v56 }
 0x5de   :  { %1731 = vrcp.f32 %v655_v57  ;;  %v242_v57 = vadd.f32 %v2026_v14, %v1965_v32 }
 0x5df   :  { %1733 = vpow2.f32 %v1561_v6 }
 0x5e8   :  { %v1732_v58 = vpop.eup %1731 }
 0x5e9   :  { %v660_v59 = vmul.f32 2.0, %v1732_v58  ;;  %v1734_v61 = vpop.eup %1733 }
 0x5ea   :  { %v654_v62 = vadd.f32 1.0, %v1734_v61 }
 0x5eb   :  { %v1563_v60 = vadd.f32 -1.0, %v660_v59 }
 0x5ec   :  { %1735 = vrcp.f32 %v654_v62 }
 0x5ed   :  { %664 = vrot.lane.b32.xlu1 %v1563_v60, %s1817_s5 }
 0x5f6   :  { %v1736_v63 = vpop.eup %1735 }
 0x5f7   :  { %v662_v5 = vmul.f32 %v1736_v63, %v539_v37 }
 0x65f   :  { %v665_v1 = vpop.permute.xlu1 %664 }
 0x660   :  { %v667_v2 = vmul.f32 %v1736_v63, %v665_v1 }
 0x662   :  { %669 = vrot.lane.b32.xlu0 %v667_v2, %s1817_s5 }
 0x6d4   :  { %v670_v7 = vpop.permute.xlu0 %669 }
 0x6d5   :  { %v672_v8 = vadd.f32 %v670_v7, %v662_v5 }
 0x6d7   :  { %1737 = vtanh.f32 %v672_v8 }
 0x6e1   :  { %v1738_v11 = vpop.eup %1737 }
 0x6e2   :  { %675 = vrot.lane.b32.xlu1 %v1738_v11, %s1817_s5 }
 0x754   :  { %v676_v25 = vpop.permute.xlu1 %675 }
 0x755   :  { %v678_v26 = vmul.f32 %v1732_v58, %v676_v25 }
 0x757   :  { %680 = vst.msk [vmem:[#allocation3 + $0x10] sm:$0xff] %vm332_vm0, %v678_v26  ;;  %v686_v27 = vpack.c.bf16 %v678_v26, %v678_v26 }
 0x759   :  { %1572 = vmatmul.mubr.msk.bf16.vlgmr.msra.gmra.mrb[16].mxu0 %vm332_vm0, %v686_v27 }
 0x75a   :  { %1005 = vmatpush1.bf16.msra.mxu0 %v1895_v9  ;;  %1036 = vmatprep.mubr.bf16.mxu0 %v1816_v0 }
 0x75b   :  { %1006 = vmatprep.subr.bf16.mxu0 %v1901_v10 }
 0x75e   :  { %1007 = vmatpush1.bf16.msra.mxu0 %v1908_v12 }
 0x75f   :  { %1008 = vmatprep.subr.bf16.mxu0 %v1913_v13 }
 0x762   :  { %1009 = vmatpush1.bf16.msra.mxu0 %v1919_v15 }
 0x763   :  { %1010 = vmatprep.subr.bf16.mxu0 %v1925_v16 }
 0x766   :  { %1011 = vmatpush1.bf16.msra.mxu0 %v1930_v19 }
 0x82c   :  { %v772_v30 = vpop.f32.mrb[16].mxu0 }
 0x82d   :  { %v779_v31 = vadd.f32 %v772_v30, %v236_v28  ;;  %v774_v33 = vpop.f32.mrb[17].mxu0 }
 0x82e   :  { %v780_v34 = vadd.f32 %v774_v33, %v238_v29  ;;  %v776_v35 = vpop.f32.mrb[18].mxu0 }
 0x82f   :  { %v777_v36 = vpop.f32.mrb[19].mxu0  ;;  %v1573_v42 = vmul.f32 -1.442695, %v779_v31  ;;  %v248_v35 = vadd.f32 %v2032_v20, %v1967_v38 }
 0x830   :  { %v1574_v37 = vmul.f32 -1.442695, %v780_v34  ;;  %v246_v34 = vadd.f32 %v2030_v18, %v1965_v32 }
 0x832   :  { %1739 = vpow2.f32 %v1574_v37 }
 0x83c   :  { %v1740_v39 = vpop.eup %1739 }
 0x83d   :  { %v788_v40 = vadd.f32 1.0, %v1740_v39 }
 0x83f   :  { %1741 = vrcp.f32 %v788_v40 }
 0x840   :  { %1743 = vpow2.f32 %v1573_v42 }
 0x849   :  { %v1742_v41 = vpop.eup %1741 }
 0x84a   :  { %v793_v44 = vmul.f32 2.0, %v1742_v41  ;;  %v1744_v46 = vpop.eup %1743 }
 0x84b   :  { %v787_v43 = vadd.f32 1.0, %v1744_v46 }
 0x84c   :  { %v1575_v45 = vadd.f32 -1.0, %v793_v44 }
 0x84d   :  { %1745 = vrcp.f32 %v787_v43 }
 0x84e   :  { %797 = vrot.lane.b32.xlu0 %v1575_v45, %s1817_s5 }
 0x857   :  { %v1746_v47 = vpop.eup %1745 }
 0x858   :  { %v795_v50 = vmul.f32 %v1746_v47, %v672_v8 }
 0x8c0   :  { %v798_v48 = vpop.permute.xlu0 %797 }
 0x8c1   :  { %v800_v49 = vmul.f32 %v1746_v47, %v798_v48 }
 0x8c3   :  { %802 = vrot.lane.b32.xlu1 %v800_v49, %s1817_s5 }
 0x935   :  { %v803_v51 = vpop.permute.xlu1 %802 }
 0x936   :  { %v805_v52 = vadd.f32 %v803_v51, %v795_v50 }
 0x938   :  { %1747 = vtanh.f32 %v805_v52 }
 0x942   :  { %v1748_v53 = vpop.eup %1747 }
 0x943   :  { %808 = vrot.lane.b32.xlu0 %v1748_v53, %s1817_s5 }
 0x9b5   :  { %v809_v54 = vpop.permute.xlu0 %808 }
 0x9b6   :  { %v811_v55 = vmul.f32 %v1742_v41, %v809_v54 }
 0x9b8   :  { %813 = vst.msk [vmem:[#allocation3 + $0x18] sm:$0xff] %vm332_vm0, %v811_v55  ;;  %v819_v56 = vpack.c.bf16 %v811_v55, %v811_v55  ;;  %v1702_v55 = vld [vmem:[%s2189_s6] sm:$0xff]  }
 0x9ba   :  { %1584 = vmatmul.mubr.msk.bf16.vlgmr.msra.gmra.mrb[12].mxu1 %vm332_vm0, %v819_v56 }
 0x9bb   :  { %1138 = vmatpush1.bf16.msra.mxu1 %v1895_v9  ;;  %1169 = vmatprep.mubr.bf16.mxu1 %v1816_v0  ;;  %v244_v9 = vadd.f32 %v2028_v17, %v1967_v38 }
 0x9bc   :  { %1139 = vmatprep.subr.bf16.mxu1 %v1901_v10 }
 0x9bf   :  { %1140 = vmatpush1.bf16.msra.mxu1 %v1908_v12 }
 0x9c0   :  { %1141 = vmatprep.subr.bf16.mxu1 %v1913_v13 }
 0x9c3   :  { %1142 = vmatpush1.bf16.msra.mxu1 %v1919_v15 }
 0x9c4   :  { %1143 = vmatprep.subr.bf16.mxu1 %v1925_v16 }
 0x9c7   :  { %1144 = vmatpush1.bf16.msra.mxu1 %v1930_v19 }
 0x9c8   :  { %1641 = vmatprep.subr.bf16.mxu1 %v1702_v55 }
 0xa8d   :  { %v905_v58 = vpop.f32.mrb[12].mxu1 }
 0xa8e   :  { %v912_v59 = vadd.f32 %v905_v58, %v242_v57  ;;  %v907_v60 = vpop.f32.mrb[13].mxu1  ;;  %v1353_v58 = vld [vmem:[#allocation3 + $0x8] sm:$0xff] }
 0xa8f   :  { %v913_v6 = vadd.f32 %v907_v60, %v244_v9  ;;  %v909_v61 = vpop.f32.mrb[14].mxu1  ;;  %v1352_v60 = vld [vmem:[#allocation3] sm:$0xff] }
 0xa90   :  { %v910_v62 = vpop.f32.mrb[15].mxu1  ;;  %v1585_v7 = vmul.f32 -1.442695, %v912_v59  ;;  %v1360_v61 = vpack.c.bf16 %v1353_v58, %v1352_v60 }
 0xa91   :  { %v1586_v63 = vmul.f32 -1.442695, %v913_v6  ;;  %v1703_v6 = vld [vmem:[%s2189_s6 + $0x8] sm:$0xff]   ;;  %v1704_v62 = vld [vmem:[%s2189_s6 + $0x10] sm:$0xff]  }
 0xa93   :  { %1749 = vpow2.f32 %v1586_v63  ;;  %v1705_v63 = vld [vmem:[%s2189_s6 + $0x18] sm:$0xff]  }
 0xa9d   :  { %v1750_v1 = vpop.eup %1749 }
 0xa9e   :  { %v921_v2 = vadd.f32 1.0, %v1750_v1  ;;  %v1355_v1 = vld [vmem:[#allocation3 + $0x18] sm:$0xff] }
 0xaa0   :  { %1751 = vrcp.f32 %v921_v2 }
 0xaa1   :  { %1753 = vpow2.f32 %v1585_v7 }
 0xaaa   :  { %v1752_v3 = vpop.eup %1751 }
 0xaab   :  { %v926_v4 = vmul.f32 2.0, %v1752_v3  ;;  %v1754_v8 = vpop.eup %1753 }
 0xaac   :  { %v920_v11 = vadd.f32 1.0, %v1754_v8  ;;  %v252_v8 = vadd.f32 %v2034_v21, %v1965_v32 }
 0xaad   :  { %v1587_v5 = vadd.f32 -1.0, %v926_v4 }
 0xaae   :  { %1755 = vrcp.f32 %v920_v11  ;;  %v254_v11 = vadd.f32 %v2036_v22, %v1967_v38 }
 0xaaf   :  { %930 = vrot.lane.b32.xlu1 %v1587_v5, %s1817_s5 }
 0xab8   :  { %v1756_v14 = vpop.eup %1755 }
 0xab9   :  { %v928_v26 = vmul.f32 %v1756_v14, %v805_v52 }
 0xb21   :  { %v931_v17 = vpop.permute.xlu1 %930 }
 0xb22   :  { %v933_v25 = vmul.f32 %v1756_v14, %v931_v17 }
 0xb24   :  { %935 = vrot.lane.b32.xlu0 %v933_v25, %s1817_s5 }
 0xb96   :  { %v936_v27 = vpop.permute.xlu0 %935 }
 0xb97   :  { %v938_v28 = vadd.f32 %v936_v27, %v928_v26 }
 0xb99   :  { %1757 = vtanh.f32 %v938_v28 }
 0xba3   :  { %v1758_v29 = vpop.eup %1757 }
 0xba4   :  { %941 = vrot.lane.b32.xlu1 %v1758_v29, %s1817_s5 }
 0xc16   :  { %v942_v30 = vpop.permute.xlu1 %941 }
 0xc17   :  { %v944_v31 = vmul.f32 %v1752_v3, %v942_v30  ;;  %v1354_v3 = vld [vmem:[#allocation3 + $0x10] sm:$0xff]  ;;  %v2113_v30 = vld [vmem:[%s2190_s7] ss:$0 sm:$0xff] }
 0xc18   :  { %v1361_v4 = vpack.c.bf16 %v1355_v1, %v1354_v3 }
 0xc19   :  { %946 = vst.msk [vmem:[#allocation3 + $0x20] sm:$0xff] %vm332_vm0, %v944_v31  ;;  %v952_v33 = vpack.c.bf16 %v944_v31, %v944_v31 }
 0xc1b   :  { %1596 = vmatmul.mubr.msk.bf16.vlgmr.msra.gmra.mrb[20].mxu0 %vm332_vm0, %v952_v33 }
 0xc1c   :  { %1302 = vmatprep.mubr.bf16.mxu0 %v1816_v0 }
 0xc20   :  { %v1356_v5 = vld [vmem:[#allocation3 + $0x20] sm:$0xff] }
 0xcee   :  { %v1038_v36 = vpop.f32.mrb[20].mxu0 }
 0xcef   :  { %v1045_v37 = vadd.f32 %v1038_v36, %v246_v34  ;;  %v1040_v39 = vpop.f32.mrb[21].mxu0 }
 0xcf0   :  { %v1046_v40 = vadd.f32 %v1040_v39, %v248_v35  ;;  %v1042_v41 = vpop.f32.mrb[22].mxu0 }
 0xcf1   :  { %v1043_v44 = vpop.f32.mrb[23].mxu0  ;;  %v1597_v18 = vmul.f32 -1.442695, %v1045_v37 }
 0xcf2   :  { %v1598_v45 = vmul.f32 -1.442695, %v1046_v40 }
 0xcf4   :  { %1759 = vpow2.f32 %v1598_v45 }
 0xcfe   :  { %v1760_v42 = vpop.eup %1759 }
 0xcff   :  { %v1054_v46 = vadd.f32 1.0, %v1760_v42 }
 0xd01   :  { %1761 = vrcp.f32 %v1054_v46 }
 0xd02   :  { %1763 = vpow2.f32 %v1597_v18 }
 0xd0b   :  { %v1762_v43 = vpop.eup %1761 }
 0xd0c   :  { %v1059_v47 = vmul.f32 2.0, %v1762_v43  ;;  %v1764_v48 = vpop.eup %1763 }
 0xd0d   :  { %v1053_v20 = vadd.f32 1.0, %v1764_v48  ;;  %v1706_v48 = vld [vmem:[%s2187_s4] ss:$8 sps:$4 sm:$0xff]  }
 0xd0e   :  { %v1599_v0 = vadd.f32 -1.0, %v1059_v47 }
 0xd0f   :  { %1765 = vrcp.f32 %v1053_v20  ;;  %v1708_v20 = vld [vmem:[%s2187_s4 + $0x4] ss:$8 sps:$4 sm:$0xff]  }
 0xd10   :  { %1063 = vrot.lane.b32.xlu0 %v1599_v0, %s1817_s5  ;;  %1270 = vmatprep.subr.bf16.mxu0 %v1708_v20 }
 0xd11   :  { %1271 = vmatpush1.bf16.msra.mxu0 %v1706_v48 }
 0xd12   :  { %1272 = vmatprep.subr.bf16.mxu0 %v1901_v10 }
 0xd15   :  { %1273 = vmatpush1.bf16.msra.mxu0 %v1908_v12 }
 0xd16   :  { %1274 = vmatprep.subr.bf16.mxu0 %v1913_v13  ;;  %v256_v13 = vadd.f32 %v2038_v23, %v1965_v32 }
 0xd19   :  { %v1766_v49 = vpop.eup %1765  ;;  %1275 = vmatpush1.bf16.msra.mxu0 %v1919_v15  ;;  %v258_v15 = vadd.f32 %v2040_v24, %v1967_v38 }
 0xd1a   :  { %v1061_v52 = vmul.f32 %v1766_v49, %v938_v28  ;;  %1276 = vmatprep.subr.bf16.mxu0 %v1925_v16 }
 0xd1d   :  { %1277 = vmatpush1.bf16.msra.mxu0 %v1930_v19 }
 0xd82   :  { %v1064_v50 = vpop.permute.xlu0 %1063 }
 0xd83   :  { %v1066_v51 = vmul.f32 %v1766_v49, %v1064_v50 }
 0xd85   :  { %1068 = vrot.lane.b32.xlu1 %v1066_v51, %s1817_s5 }
 0xdf7   :  { %v1069_v53 = vpop.permute.xlu1 %1068 }
 0xdf8   :  { %v2085_v54 = vadd.f32 %v1069_v53, %v1061_v52 }
 0xdfa   :  { %1767 = vtanh.f32 %v2085_v54 }
 0xe04   :  { %v1768_v56 = vpop.eup %1767 }
 0xe05   :  { %1074 = vrot.lane.b32.xlu0 %v1768_v56, %s1817_s5 }
 0xe77   :  { %v1075_v57 = vpop.permute.xlu0 %1074 }
 0xe78   :  { %v1077_v9 = vmul.f32 %v1762_v43, %v1075_v57 }
 0xe7a   :  { %1079 = vst.msk [vmem:[#allocation3 + $0x28] sm:$0xff] %vm332_vm0, %v1077_v9  ;;  %v1085_v59 = vpack.c.bf16 %v1077_v9, %v1077_v9 }
 0xe7c   :  { %1608 = vmatmul.mubr.msk.bf16.vlgmr.msra.gmra.mrb[16].mxu1 %vm332_vm0, %v1085_v59 }
 0xe7d   :  { %1642 = vmatpush3.bf16.msra.mxu1 %v1702_v55  ;;  %1649 = vmatprep.mubr.msk.bf16.mxu1 %vm332_vm0, %v1360_v61 }
 0xe7e   :  { %1643 = vmatprep.subr.bf16.mxu1 %v1703_v6 }
 0xe81   :  { %1644 = vmatpush3.bf16.msra.mxu1 %v1703_v6  ;;  %v1357_v2 = vld [vmem:[#allocation3 + $0x28] sm:$0xff] }
 0xe82   :  { %1645 = vmatprep.subr.bf16.mxu1 %v1704_v62  ;;  %v1362_v7 = vpack.c.bf16 %v1357_v2, %v1356_v5 }
 0xe85   :  { %1646 = vmatpush3.bf16.msra.mxu1 %v1704_v62 }
 0xe86   :  { %1647 = vmatprep.subr.bf16.mxu1 %v1705_v63 }
 0xe89   :  { %1648 = vmatpush3.bf16.msra.mxu1 %v1705_v63 }
 0xe8c   :  { %1650 = vmatmul.mubr.msk.bf16.vlgmr.msra.gmra.mrb[20].mxu1 %vm332_vm0, %v1361_v4 }
 0xe8d   :  { %1653 = vmatprep.mubr.msk.bf16.mxu1 %vm332_vm0, %v1362_v7 }
 0xf4f   :  { %v1171_v14 = vpop.f32.mrb[16].mxu1 }
 0xf50   :  { %v1178_v17 = vadd.f32 %v1171_v14, %v252_v8  ;;  %v1173_v25 = vpop.f32.mrb[17].mxu1 }
 0xf51   :  { %v1179_v26 = vadd.f32 %v1173_v25, %v254_v11  ;;  %v1175_v27 = vpop.f32.mrb[18].mxu1 }
 0xf52   :  { %v1176_v28 = vpop.f32.mrb[19].mxu1  ;;  %v1609_v42 = vmul.f32 -1.442695, %v1178_v17 }
 0xf53   :  { %v1610_v29 = vmul.f32 -1.442695, %v1179_v26 }
 0xf55   :  { %1769 = vpow2.f32 %v1610_v29 }
 0xf5f   :  { %v1770_v31 = vpop.eup %1769  ;;  %v1651_v33 = vpop.f32.mrb[20].mxu1 }
 0xf60   :  { %v1187_v34 = vadd.f32 1.0, %v1770_v31  ;;  %v1458_v21 = vadd.f32 %v1651_v33, %v2113_v30  ;;  %v1449_v35 = vpop.f32.mrb[21].mxu1 }
 0xf61   :  { %v1450_v22 = vadd.f32 %v2113_v30, %v1449_v35  ;;  %v1652_v36 = vpop.f32.mrb[22].mxu1 }
 0xf62   :  { %1771 = vrcp.f32 %v1187_v34  ;;  %1482 = vst [vmem:[%s2191_s8 + $0x10] sm:$0xff] %v1458_v21  ;;  %v1461_v37 = vadd.f32 %v1652_v36, %v2113_v30  ;;  %v1452_v39 = vpop.f32.mrb[23].mxu1 }
 0xf63   :  { %1480 = vst [vmem:[%s2191_s8] sm:$0xff] %v1450_v22  ;;  %v1453_v40 = vadd.f32 %v2113_v30, %v1452_v39  ;;  %1773 = vpow2.f32 %v1609_v42 }
 0xf64   :  { %1483 = vst [vmem:[%s2191_s8 + $0x18] sm:$0xff] %v1461_v37 }
 0xf65   :  { %1481 = vst [vmem:[%s2191_s8 + $0x8] sm:$0xff] %v1453_v40 }
 0xf6c   :  { %v1772_v41 = vpop.eup %1771 }
 0xf6d   :  { %v1192_v44 = vmul.f32 2.0, %v1772_v41  ;;  %v1774_v46 = vpop.eup %1773 }
 0xf6e   :  { %v1186_v43 = vadd.f32 1.0, %v1774_v46 }
 0xf6f   :  { %v1611_v45 = vadd.f32 -1.0, %v1192_v44 }
 0xf70   :  { %1775 = vrcp.f32 %v1186_v43 }
 0xf71   :  { %1196 = vrot.lane.b32.xlu1 %v1611_v45, %s1817_s5 }
 0xf7a   :  { %v1776_v47 = vpop.eup %1775 }
 0xf7b   :  { %v1194_v49 = vmul.f32 %v1776_v47, %v2085_v54 }
 0xfe3   :  { %v1197_v0 = vpop.permute.xlu1 %1196 }
 0xfe4   :  { %v1199_v18 = vmul.f32 %v1776_v47, %v1197_v0 }
 0xfe6   :  { %1201 = vrot.lane.b32.xlu0 %v1199_v18, %s1817_s5 }
0x1058   :  { %v1202_v50 = vpop.permute.xlu0 %1201 }
0x1059   :  { %v1204_v51 = vadd.f32 %v1202_v50, %v1194_v49 }
0x105b   :  { %1777 = vtanh.f32 %v1204_v51 }
0x1065   :  { %v1778_v52 = vpop.eup %1777 }
0x1066   :  { %1207 = vrot.lane.b32.xlu1 %v1778_v52, %s1817_s5 }
0x10d8   :  { %v1208_v53 = vpop.permute.xlu1 %1207 }
0x10d9   :  { %v1210_v10 = vmul.f32 %v1772_v41, %v1208_v53 }
0x10db   :  { %1212 = vst.msk [vmem:[#allocation3 + $0x30] sm:$0xff] %vm332_vm0, %v1210_v10  ;;  %v1218_v12 = vpack.c.bf16 %v1210_v10, %v1210_v10 }
0x10dd   :  { %1620 = vmatmul.mubr.msk.bf16.vlgmr.msra.gmra.mrb[24].mxu0 %vm332_vm0, %v1218_v12 }
0x10e2   :  { %v1358_v11 = vld [vmem:[#allocation3 + $0x30] sm:$0xff] }
0x11b0   :  { %v1304_v16 = vpop.f32.mrb[24].mxu0 }
0x11b1   :  { %v1311_v19 = vadd.f32 %v1304_v16, %v256_v13  ;;  %v1306_v54 = vpop.f32.mrb[25].mxu0 }
0x11b2   :  { %v1312_v55 = vadd.f32 %v1306_v54, %v258_v15  ;;  %v1308_v56 = vpop.f32.mrb[26].mxu0 }
0x11b3   :  { %v1309_v57 = vpop.f32.mrb[27].mxu0  ;;  %v1621_v32 = vmul.f32 -1.442695, %v1311_v19 }
0x11b4   :  { %v1622_v9 = vmul.f32 -1.442695, %v1312_v55 }
0x11b6   :  { %1779 = vpow2.f32 %v1622_v9 }
0x11c0   :  { %v1780_v58 = vpop.eup %1779 }
0x11c1   :  { %v1320_v59 = vadd.f32 1.0, %v1780_v58 }
0x11c3   :  { %1781 = vrcp.f32 %v1320_v59 }
0x11c4   :  { %1783 = vpow2.f32 %v1621_v32 }
0x11cd   :  { %v1782_v60 = vpop.eup %1781 }
0x11ce   :  { %v1325_v6 = vmul.f32 2.0, %v1782_v60  ;;  %v1784_v23 = vpop.eup %1783 }
0x11cf   :  { %v1319_v38 = vadd.f32 1.0, %v1784_v23 }
0x11d0   :  { %v1623_v61 = vadd.f32 -1.0, %v1325_v6 }
0x11d1   :  { %1785 = vrcp.f32 %v1319_v38 }
0x11d2   :  { %1329 = vrot.lane.b32.xlu0 %v1623_v61, %s1817_s5 }
0x11db   :  { %v1786_v24 = vpop.eup %1785 }
0x11dc   :  { %v1327_v1 = vmul.f32 %v1786_v24, %v1204_v51 }
0x1244   :  { %v1330_v62 = vpop.permute.xlu0 %1329 }
0x1245   :  { %v1332_v63 = vmul.f32 %v1786_v24, %v1330_v62 }
0x1247   :  { %1334 = vrot.lane.b32.xlu1 %v1332_v63, %s1817_s5 }
0x12b9   :  { %v1335_v2 = vpop.permute.xlu1 %1334 }
0x12ba   :  { %v1337_v3 = vadd.f32 %v1335_v2, %v1327_v1 }
0x12bc   :  { %1787 = vtanh.f32 %v1337_v3  ;;  %1348 = vrot.lane.b32.xlu1 %v1337_v3, %s1817_s5 }
0x12c6   :  { %v1788_v4 = vpop.eup %1787 }
0x12c7   :  { %1340 = vrot.lane.b32.xlu0 %v1788_v4, %s1817_s5 }
0x132e   :  { %v1349_v5 = vpop.permute.xlu1 %1348 }
0x132f   :  { %1351 = vst.msk [vmem:[%s2193_s10] sm:$0xff] %vm332_vm0, %v1349_v5 }
0x1339   :  { %v1341_v7 = vpop.permute.xlu0 %1340 }
0x133a   :  { %v1343_v8 = vmul.f32 %v1782_v60, %v1341_v7 }
0x133c   :  { %1345 = vst.msk [vmem:[#allocation3 + $0x38] sm:$0xff] %vm332_vm0, %v1343_v8  ;;  %1346 = vst.msk [vmem:[%s2192_s9] sm:$0xff] %vm332_vm0, %v1343_v8 }
0x1343   :  { %v1359_v14 = vld [vmem:[#allocation3 + $0x38] sm:$0xff] }
0x1344   :  { %v1363_v17 = vpack.c.bf16 %v1359_v14, %v1358_v11 }
0x1346   :  { %1654 = vmatmul.mubr.msk.bf16.gmra.mrb[24].mxu1 %vm332_vm0, %v1363_v17 }
0x1419   :  { %v1655_v25 = vpop.f32.mrb[24].mxu1 }
0x141a   :  { %v1474_v26 = vadd.f32 %v1655_v25, %v2113_v30  ;;  %v1465_v27 = vpop.f32.mrb[25].mxu1 }
0x141b   :  { %v1466_v28 = vadd.f32 %v2113_v30, %v1465_v27  ;;  %v1656_v29 = vpop.f32.mrb[26].mxu1 }
0x141c   :  { %1486 = vst [vmem:[%s2191_s8 + $0x30] sm:$0xff] %v1474_v26  ;;  %v1477_v31 = vadd.f32 %v1656_v29, %v2113_v30  ;;  %v1468_v33 = vpop.f32.mrb[27].mxu1 }
0x141d   :  { %1484 = vst [vmem:[%s2191_s8 + $0x20] sm:$0xff] %v1466_v28  ;;  %v1469_v34 = vadd.f32 %v2113_v30, %v1468_v33 }
0x141e   :  { %1487 = vst [vmem:[%s2191_s8 + $0x38] sm:$0xff] %v1477_v31 }
0x141f   :  { %1485 = vst [vmem:[%s2191_s8 + $0x28] sm:$0xff] %v1469_v34 }
0x1420   :  { %1500 = vsyncpa [#allocation5], 1 }

</bundles_post_ra>
